<compile_context>
chip_gen: v7x
topology: tpu7x:2x2x1
jax: 0.10.0
libtpu: 0.0.40
codegen_flags: <defaults>
</compile_context>

<pallas_src>
import functools
import math

import jax
import jax.numpy as jnp
from jax.experimental import pallas as pl
from jax.experimental.pallas import tpu as pltpu


def _en_res_block_kernel(x_ref, w_ref, shift_ref, out_ref, *, L, Cout, Cpad, has_proj):
    # x_ref    : (TL, Cin)   activations in compute dtype, TL = NB * L (whole sequences)
    # w_ref    : (Cin, Wtot) packed weights: [tap0 | pad | tap1 | pad | tap2 | pad | proj]
    #            taps carry the BatchNorm(eval) scale pre-folded; segments start at
    #            128-aligned lane offsets (Cpad = round_up(Cout, 128)).
    # shift_ref: (1, Cout) f32 folded BatchNorm shift
    x = x_ref[...]
    tl = x.shape[0]

    # Boundary masks from iota (no streamed mask inputs): a row is the first/last row of
    # its sequence iff (row % L) == 0 / == L-1.  Blocks pack whole sequences, so the
    # masks are block-invariant.
    row = jax.lax.broadcasted_iota(jnp.int32, (tl, 1), 0)
    pos = row % L
    not_first = pos != 0
    not_last = pos != (L - 1)

    # One full-width MXU matmul for all three taps (+ projection); slices below are at
    # 128-aligned lane offsets and therefore free vreg selections.
    y = jnp.dot(x, w_ref[...], preferred_element_type=jnp.float32)   # (TL, Wtot) f32
    y_prev = y[:, 0:Cout]                       # contributes to output row l+1
    y_mid = y[:, Cpad:Cpad + Cout]              # contributes to output row l
    y_next = y[:, 2 * Cpad:2 * Cpad + Cout]     # contributes to output row l-1

    # The +-1 row shifts of the k=3 conv are XLU sublane rotations; the masks zero rows
    # that wrapped across a sequence boundary, reproducing Conv1d's zero padding.
    acc = y_mid
    acc = acc + jnp.where(not_first, pltpu.roll(y_prev, 1, 0), 0.0)
    acc = acc + jnp.where(not_last, pltpu.roll(y_next, tl - 1, 0), 0.0)

    # BatchNorm shift (scale already folded) + ReLU; dropout = identity (eval).
    act = jnp.maximum(acc + shift_ref[...], 0.0)

    # Residual branch: 1x1 projection (already computed in the packed matmul) or the
    # input itself when Cin == Cout.
    if has_proj:
        res = y[:, 3 * Cpad:3 * Cpad + Cout]
    else:
        res = x.astype(jnp.float32)

    # TODO(synk): with tiny Cout the output stores stay lane-masked; fusing the next op
    #             or a lane-dense output slab would remove that cost.
    out_ref[...] = (act + res).astype(out_ref.dtype)


def _hardware_hints():
    """(num_tensorcores, vmem_capacity_bytes) with conservative fallbacks."""
    vmem = 64 * 1024 * 1024          # conservative (v7x per-core VMEM)
    cores = 1
    try:
        vmem = int(pltpu.get_tpu_info().vmem_capacity_bytes)
    except Exception:
        pass
    try:
        kind = jax.devices()[0].device_kind.lower()
        if any(tag in kind for tag in ("v7", "tpu7", "v4", "v3")):
            cores = 2                # 2 TensorCores / megacore; v5e & v6e are 1 TC
    except Exception:
        pass
    return cores, vmem


def _choose_block_batch(N, L, Cin, Cout, Wtot, compute_dtype, out_dtype):
    """(sequences per grid block, vmem_limit_bytes) — generation aware."""
    cd = jnp.dtype(compute_dtype).itemsize
    ob = jnp.dtype(out_dtype).itemsize
    sub = 16 if min(cd, ob) < 4 else 8           # sublane alignment for TL = NB*L
    nb_align = sub // math.gcd(L, sub)

    cores, vmem_cap = _hardware_hints()
    vmem_limit = int(min(vmem_cap // 2, 64 * 1024 * 1024))
    # Per-sequence VMEM working set: double-buffered x & out + f32 matmul/epilogue temps.
    per_seq = L * (2 * Cin * cd + 2 * Cout * ob + (Wtot + 2 * Cout) * 4)
    budget = max(1 << 20, vmem_limit // 6)
    nb = max(1, min(N, budget // max(per_seq, 1)))
    if cores >= 2:
        # ~4 pipelined 'parallel' grid steps per TensorCore so DMA overlaps compute.
        # Single-TC chips (v5e/v6e) instead take the largest block that fits: the grid
        # is a serial loop there and splitting only adds per-step overhead.
        nb = min(nb, max(1, -(-N // (4 * cores))))
    nb = max(nb_align, (nb // nb_align) * nb_align)
    return nb, vmem_limit


def en_res_block_nlc(x_nlc, conv1_w, proj_w, gamma, beta, running_mean, running_var,
                     *, eps=1e-5, compute_dtype=jnp.bfloat16, out_dtype=None):
    """EnResBlock forward (eval semantics), channels-last: (N, L, Cin) -> (N, L, Cout).

    bf16 compute is the recommended default on v5e/v6e/v7x (full-rate MXU, half the
    activation DMA bytes); accumulation and the epilogue are f32 regardless."""
    N, L, Cin = x_nlc.shape
    Cout = conv1_w.shape[0]
    has_proj = proj_w is not None
    if not has_proj:
        assert Cin == Cout, "identity residual requires Cin == Cout"
    if out_dtype is None:
        out_dtype = compute_dtype
    f32 = jnp.float32

    # Fold BatchNorm(eval) scale into the conv taps; keep only the per-channel shift.
    inv_std = 1.0 / jnp.sqrt(running_var.astype(f32) + eps)
    scale = gamma.astype(f32) * inv_std                                      # (Cout,)
    shift = (beta.astype(f32) - running_mean.astype(f32) * scale)[None, :]   # (1, Cout)
    w_taps = jnp.transpose(conv1_w.astype(f32), (2, 1, 0)) * scale[None, None, :]  # (3,Cin,Cout)

    # Pack taps (+ projection) along the output axis, each segment 128-lane aligned.
    Cpad = ((Cout + 127) // 128) * 128
    n_seg = 4 if has_proj else 3
    Wtot = (n_seg - 1) * Cpad + Cout
    w_all = jnp.zeros((Cin, Wtot), f32)
    w_all = w_all.at[:, 0:Cout].set(w_taps[0])
    w_all = w_all.at[:, Cpad:Cpad + Cout].set(w_taps[1])
    w_all = w_all.at[:, 2 * Cpad:2 * Cpad + Cout].set(w_taps[2])
    if has_proj:
        wproj = jnp.transpose(proj_w[:, :, 0].astype(f32), (1, 0))           # (Cin, Cout)
        w_all = w_all.at[:, 3 * Cpad:3 * Cpad + Cout].set(wproj)
    w_all = w_all.astype(compute_dtype)

    # Pack NB whole sequences per grid block; flatten (N, L) -> rows.
    NB, vmem_limit = _choose_block_batch(N, L, Cin, Cout, Wtot, compute_dtype, out_dtype)
    n_pad = -(-N // NB) * NB
    x = x_nlc.astype(compute_dtype)
    if n_pad != N:
        x = jnp.pad(x, ((0, n_pad - N), (0, 0), (0, 0)))
    TL = NB * L
    x_rows = x.reshape(n_pad * L, Cin)

    kernel = functools.partial(_en_res_block_kernel,
                               L=L, Cout=Cout, Cpad=Cpad, has_proj=has_proj)
    out_rows = pl.pallas_call(
        kernel,
        out_shape=jax.ShapeDtypeStruct((n_pad * L, Cout), out_dtype),
        grid_spec=pltpu.PrefetchScalarGridSpec(
            num_scalar_prefetch=0,
            grid=(n_pad // NB,),
            in_specs=[
                pl.BlockSpec((TL, Cin), lambda i: (i, 0)),
                # TODO(synk): constant-index-map weights may still be double-buffered by
                #             the pipeline; a one-shot scratch copy (or reduced buffering)
                #             would reclaim that VMEM at large Cin/Cout.
                pl.BlockSpec((Cin, Wtot), lambda i: (0, 0)),
                pl.BlockSpec((1, Cout), lambda i: (0, 0)),
            ],
            out_specs=pl.BlockSpec((TL, Cout), lambda i: (i, 0)),
        ),
        compiler_params=pltpu.CompilerParams(
            dimension_semantics=("parallel",),
            vmem_limit_bytes=vmem_limit,
        ),
    )(x_rows, w_all, shift)

    out = out_rows.reshape(n_pad, L, Cout)
    if n_pad != N:
        out = out[:N]
    return out


def en_res_block(x_ncl, conv1_w, proj_w, gamma, beta, running_mean, running_var,
                 *, eps=1e-5, compute_dtype=jnp.bfloat16, out_dtype=None):
    """PyTorch-layout wrapper: (N, Cin, L) -> (N, Cout, L).

    Prefer en_res_block_nlc with channels-last data to avoid the two HBM transposes."""
    out_nlc = en_res_block_nlc(jnp.transpose(x_ncl, (0, 2, 1)), conv1_w, proj_w,
                               gamma, beta, running_mean, running_var,
                               eps=eps, compute_dtype=compute_dtype, out_dtype=out_dtype)
    return jnp.transpose(out_nlc, (0, 2, 1))


def _ref_forward(x, conv1_w, proj_w, gamma, beta, mean, var, eps=1e-5):
    """Pure-JAX reference (PyTorch eval-mode semantics) for verification."""
    dn = ('NCH', 'OIH', 'NCH')
    out = jax.lax.conv_general_dilated(x, conv1_w, window_strides=(1,),
                                       padding=((1, 1),), dimension_numbers=dn)
    inv = 1.0 / jnp.sqrt(var + eps)
    out = (out - mean[None, :, None]) * (gamma * inv)[None, :, None] + beta[None, :, None]
    out = jnp.maximum(out, 0.0)
    if proj_w is not None:
        x = jax.lax.conv_general_dilated(x, proj_w, window_strides=(1,),
                                         padding=((0, 0),), dimension_numbers=dn)
    return out + x


if __name__ == "__main__":
    key = jax.random.PRNGKey(0)
    k_x, k_w1, k_wp, k_g, k_b, k_m, k_v, k_x2, k_w2 = jax.random.split(key, 9)

    N, Cin, Cout, L = 2, 4, 8, 16
    x = jax.random.normal(k_x, (N, Cin, L), dtype=jnp.float32)

    # conv1: xavier_uniform_ as in init_weights()
    fan_in, fan_out = Cin * 3, Cout * 3
    bound = (6.0 / (fan_in + fan_out)) ** 0.5
    conv1_w = jax.random.uniform(k_w1, (Cout, Cin, 3), minval=-bound, maxval=bound,
                                 dtype=jnp.float32)
    # 1x1 projection conv (input_size != output_size)
    bound_p = (6.0 / (Cin + Cout)) ** 0.5
    proj_w = jax.random.uniform(k_wp, (Cout, Cin, 1), minval=-bound_p, maxval=bound_p,
                                dtype=jnp.float32)

    # BatchNorm1d parameters / running stats (deterministic, non-trivial)
    gamma = jax.random.uniform(k_g, (Cout,), minval=0.5, maxval=1.5, dtype=jnp.float32)
    beta = 0.1 * jax.random.normal(k_b, (Cout,), dtype=jnp.float32)
    running_mean = 0.1 * jax.random.normal(k_m, (Cout,), dtype=jnp.float32)
    running_var = jax.random.uniform(k_v, (Cout,), minval=0.5, maxval=1.5, dtype=jnp.float32)

    ref = _ref_forward(x, conv1_w, proj_w, gamma, beta, running_mean, running_var)

    # 1) exact-structure check: f32 MXU path (f32 output) vs the lax.conv reference
    out_f32 = jax.block_until_ready(en_res_block(
        x, conv1_w, proj_w, gamma, beta, running_mean, running_var,
        compute_dtype=jnp.float32))
    assert out_f32.shape == (N, Cout, L)
    assert out_f32.dtype == jnp.float32
    assert jnp.allclose(out_f32, ref, rtol=1e-5, atol=1e-5), "f32 kernel mismatch vs reference"

    # 2) default bf16 path (bf16 in/out, f32 accumulate + f32 epilogue): looser tolerance
    out_bf16 = jax.block_until_ready(en_res_block(
        x, conv1_w, proj_w, gamma, beta, running_mean, running_var))
    assert out_bf16.shape == (N, Cout, L)
    assert out_bf16.dtype == jnp.bfloat16
    assert jnp.allclose(out_bf16.astype(jnp.float32), ref, rtol=5e-2, atol=1e-1), \
        "bf16 kernel mismatch vs reference"

    # 3) identity-residual path (Cin == Cout, no 1x1 projection), f32
    C = 8
    x2 = jax.random.normal(k_x2, (N, C, L), dtype=jnp.float32)
    bound2 = (6.0 / (C * 3 + C * 3)) ** 0.5
    conv2_w = jax.random.uniform(k_w2, (C, C, 3), minval=-bound2, maxval=bound2,
                                 dtype=jnp.float32)
    ref2 = _ref_forward(x2, conv2_w, None, gamma, beta, running_mean, running_var)
    out2 = jax.block_until_ready(en_res_block(
        x2, conv2_w, None, gamma, beta, running_mean, running_var,
        compute_dtype=jnp.float32))
    assert jnp.allclose(out2, ref2, rtol=1e-5, atol=1e-5), "no-projection kernel mismatch vs reference"

    print("KERNEL_OK")
</pallas_src>

<mosaic_0001>
module attributes {stable_mosaic.version = 11 : i64} {
  func.func @_en_res_block_kernel(%arg0: i32, %arg1: memref<32x4xf32, #tpu.memory_space<vmem>>, %arg2: memref<4x392xf32, #tpu.memory_space<vmem>>, %arg3: memref<1x8xf32, #tpu.memory_space<vmem>>, %arg4: memref<32x8xf32, #tpu.memory_space<vmem>>) attributes {dimension_semantics = [#tpu.dimension_semantics<parallel>], iteration_bounds = array<i64: 1>, scalar_prefetch = 0 : i64, scratch_operands = 0 : i64, tpu.core_type = #tpu.core_type<tc>, window_params = [{transform_indices = @transform_0, window_bounds = array<i64: 32, 4>}, {pipeline_mode = #tpu.pipeline_mode<synchronous>, transform_indices = @transform_1, window_bounds = array<i64: 4, 392>}, {pipeline_mode = #tpu.pipeline_mode<synchronous>, transform_indices = @transform_2, window_bounds = array<i64: 1, 8>}, {transform_indices = @transform_3, window_bounds = array<i64: 32, 8>}]} {
    %c0 = arith.constant 0 : index
    %c0_0 = arith.constant 0 : index
    %0 = vector.load %arg1[%c0, %c0_0] : memref<32x4xf32, #tpu.memory_space<vmem>>, vector<32x4xf32>
    %1 = tpu.iota {dimensions = array<i32: 0>} : vector<32x1xi32>
    %c16_i32 = arith.constant 16 : i32
    %c0_i32 = arith.constant 0 : i32
    %2 = arith.cmpi eq, %c16_i32, %c0_i32 : i32
    %c1_i32 = arith.constant 1 : i32
    %3 = arith.select %2, %c1_i32, %c16_i32 : i32
    %4 = vector.broadcast %3 : i32 to vector<32x1xi32>
    %5 = arith.remsi %1, %4 : vector<32x1xi32>
    %c0_i32_1 = arith.constant 0 : i32
    %6 = vector.broadcast %c0_i32_1 : i32 to vector<32x1xi32>
    %7 = arith.cmpi ne, %5, %6 : vector<32x1xi32>
    %c0_i32_2 = arith.constant 0 : i32
    %8 = vector.broadcast %c0_i32_2 : i32 to vector<32x1xi32>
    %9 = arith.cmpi slt, %5, %8 : vector<32x1xi32>
    %c0_i32_3 = arith.constant 0 : i32
    %10 = arith.cmpi slt, %3, %c0_i32_3 : i32
    %11 = vector.broadcast %10 : i1 to vector<32x1xi1>
    %12 = vector.broadcast %11 : vector<32x1xi1> to vector<32x1xi1>
    %13 = arith.xori %9, %12 : vector<32x1xi1>
    %14 = arith.andi %13, %7 : vector<32x1xi1>
    %15 = vector.broadcast %3 : i32 to vector<32x1xi32>
    %16 = arith.addi %5, %15 : vector<32x1xi32>
    %17 = arith.select %14, %16, %5 : vector<32x1xi1>, vector<32x1xi32>
    %c0_i32_4 = arith.constant 0 : i32
    %18 = vector.broadcast %c0_i32_4 : i32 to vector<32x1xi32>
    %19 = arith.cmpi ne, %17, %18 : vector<32x1xi32>
    %c15_i32 = arith.constant 15 : i32
    %20 = vector.broadcast %c15_i32 : i32 to vector<32x1xi32>
    %21 = arith.cmpi ne, %17, %20 : vector<32x1xi32>
    %c0_5 = arith.constant 0 : index
    %c0_6 = arith.constant 0 : index
    %22 = vector.load %arg2[%c0_5, %c0_6] : memref<4x392xf32, #tpu.memory_space<vmem>>, vector<4x392xf32>
    %cst = arith.constant dense<0.000000e+00> : vector<32x392xf32>
    %23 = tpu.matmul %0, %22, %cst {dimension_numbers = #tpu.dot_dimension_numbers<[1], [0], [0], [1], [0, 0, 1, 1], [], []>} : vector<32x4xf32>, vector<4x392xf32>, vector<32x392xf32> -> vector<32x392xf32>
    %24 = vector.extract_strided_slice %23 {offsets = [0, 0], sizes = [32, 8], strides = [1, 1]} : vector<32x392xf32> to vector<32x8xf32>
    %25 = vector.extract_strided_slice %23 {offsets = [0, 128], sizes = [32, 8], strides = [1, 1]} : vector<32x392xf32> to vector<32x8xf32>
    %26 = vector.extract_strided_slice %23 {offsets = [0, 256], sizes = [32, 8], strides = [1, 1]} : vector<32x392xf32> to vector<32x8xf32>
    %c1_i32_7 = arith.constant 1 : i32
    %27 = tpu.dynamic_rotate %24 by %c1_i32_7 dim 0 : vector<32x8xf32>, i32 -> vector<32x8xf32>
    %cst_8 = arith.constant 0.000000e+00 : f32
    %28 = vector.shape_cast %19 : vector<32x1xi1> to vector<32x1xi1>
    %29 = vector.broadcast %28 : vector<32x1xi1> to vector<32x8xi1>
    %30 = vector.broadcast %cst_8 : f32 to vector<32x8xf32>
    %31 = arith.select %29, %27, %30 : vector<32x8xi1>, vector<32x8xf32>
    %32 = arith.addf %25, %31 : vector<32x8xf32>
    %c31_i32 = arith.constant 31 : i32
    %33 = tpu.dynamic_rotate %26 by %c31_i32 dim 0 : vector<32x8xf32>, i32 -> vector<32x8xf32>
    %cst_9 = arith.constant 0.000000e+00 : f32
    %34 = vector.shape_cast %21 : vector<32x1xi1> to vector<32x1xi1>
    %35 = vector.broadcast %34 : vector<32x1xi1> to vector<32x8xi1>
    %36 = vector.broadcast %cst_9 : f32 to vector<32x8xf32>
    %37 = arith.select %35, %33, %36 : vector<32x8xi1>, vector<32x8xf32>
    %38 = arith.addf %32, %37 : vector<32x8xf32>
    %c0_10 = arith.constant 0 : index
    %c0_11 = arith.constant 0 : index
    %39 = vector.load %arg3[%c0_10, %c0_11] : memref<1x8xf32, #tpu.memory_space<vmem>>, vector<1x8xf32>
    %40 = vector.broadcast %39 : vector<1x8xf32> to vector<32x8xf32>
    %41 = arith.addf %38, %40 : vector<32x8xf32>
    %cst_12 = arith.constant 0.000000e+00 : f32
    %42 = vector.broadcast %cst_12 : f32 to vector<32x8xf32>
    %43 = arith.maximumf %41, %42 : vector<32x8xf32>
    %44 = vector.extract_strided_slice %23 {offsets = [0, 384], sizes = [32, 8], strides = [1, 1]} : vector<32x392xf32> to vector<32x8xf32>
    %45 = arith.addf %43, %44 : vector<32x8xf32>
    %c0_13 = arith.constant 0 : index
    %c0_14 = arith.constant 0 : index
    %46 = vector.load %arg4[%c0_13, %c0_14] : memref<32x8xf32, #tpu.memory_space<vmem>>, vector<32x8xf32>
    tpu.vector_store %arg4[%c0_13, %c0_14], %45 {strides = array<i32>} : memref<32x8xf32, #tpu.memory_space<vmem>>, vector<32x8xf32>,
    return
  }
  func.func @transform_0(%arg0: i32) -> (i32, i32) {
    %c0_i32 = arith.constant 0 : i32
    %c0_i32_0 = arith.constant 0 : i32
    return %arg0, %c0_i32 : i32, i32
  }
  func.func @transform_1(%arg0: i32) -> (i32, i32) {
    %c0_i32 = arith.constant 0 : i32
    %c0_i32_0 = arith.constant 0 : i32
    %c0_i32_1 = arith.constant 0 : i32
    return %c0_i32, %c0_i32_0 : i32, i32
  }
  func.func @transform_2(%arg0: i32) -> (i32, i32) {
    %c0_i32 = arith.constant 0 : i32
    %c0_i32_0 = arith.constant 0 : i32
    %c0_i32_1 = arith.constant 0 : i32
    return %c0_i32, %c0_i32_0 : i32, i32
  }
  func.func @transform_3(%arg0: i32) -> (i32, i32) {
    %c0_i32 = arith.constant 0 : i32
    %c0_i32_0 = arith.constant 0 : i32
    return %arg0, %c0_i32 : i32, i32
  }
}

</mosaic_0001>

<bundles_post_ra>
// kernel: tpu_custom_call.1
= control target key start
LH: loop header
LB: loop body
LE: loop exit
PB: predicated region body
PF: predicated region fallthrough
CT: control target
= control target key end

     0   :  { %vm98_vm0 = vcmask 1043456   ;;  %v379_v2 = vmov 0.0   ;;  %vm85_vm1 = vcmask 31744   ;;  %v18_v9 = vlaneseq  ;;  %s464_s1 = inlined_call_operand.vmem [shape: f32[4,392], index: 1, kind: input, shape index: {}]   ;;  %s465_s0 = inlined_call_operand.vmem [shape: f32[32,4], index: 0, kind: input, shape index: {}]   ;;  %s466_s2 = inlined_call_operand.vmem [shape: f32[1,8], index: 2, kind: input, shape index: {}]   ;;  %s467_s3 = inlined_call_operand.vmem [shape: f32[32,8], index: 3, kind: output, shape index: {}]  }
   0x1   :  { %v79_v0 = vld [vmem:[%s464_s1] sm:$0xff]  ;;  %v80_v1 = vld [vmem:[%s464_s1 + $0x8] sm:$0xff]  ;;  %171 = vmatprep.mubr.f32.mxu0 %v379_v2  ;;  %260 = vmatprep.mubr.f32.mxu1 %v379_v2  ;;  %v16_v7 = vld [vmem:[%s465_s0 + $0x10] sm:$0xff]  ;;  %vm354_vm8 = vcmask 64512  }
   0x2   :  { %v83_v3 = vcombine.high %v79_v0, %v79_v0  ;;  %v84_v4 = vcombine.high %v80_v1, %v80_v1  ;;  %v14_v5 = vld [vmem:[%s465_s0] sm:$0xff]  ;;  %v15_v6 = vld [vmem:[%s465_s0 + $0x8] sm:$0xff]  ;;  %v17_v8 = vld [vmem:[%s465_s0 + $0x18] sm:$0xff]  ;;  %v19_v10 = vshrl.u32 %v18_v9, 7 }
   0x3   :  { %v375_v53 = vld [vmem:[%s466_s2] ss:$0 sm:$0xff] }
   0x4   :  { %363 = vmatprep.subr.msk.mxu0 %vm98_vm0, %v83_v3  ;;  %369 = vmatprep.subr.msk.mxu1 %vm98_vm0, %v84_v4  ;;  %v20_v13 = vadd.s32 8, %v19_v10  ;;  %v21_v14 = vadd.s32 16, %v19_v10  ;;  %vm314_vm2 = vcmp.lt.s32.totalorder %v19_v10, 7  ;;  %vm289_vm3 = vcmp.lt.s32.totalorder %v19_v10, 1 }
   0x5   :  { %364 = vmatpush1.msk.msra.mxu0 %vm98_vm0, %v79_v0  ;;  %370 = vmatpush1.msk.msra.mxu1 %vm98_vm0, %v80_v1  ;;  %v22_v21 = vadd.s32 24, %v19_v10  ;;  %v27_v33 = vand.u32 15, %v19_v10 }
   0x6   :  { %365 = vmatmul.mubr.msk.f32.vlgmr.msra.gmra.mrb[0].mxu0 %vm85_vm1, %v14_v5  ;;  %371 = vmatmul.mubr.msk.f32.vlgmr.msra.gmra.mrb[0].mxu1 %vm85_vm1, %v14_v5  ;;  %v34_v19 = vand.u32 15, %v20_v13  ;;  %v41_v20 = vand.u32 15, %v21_v14 }
   0x7   :  { %177 = vmatprep.mubr.f32.mxu0 %v379_v2  ;;  %266 = vmatprep.mubr.f32.mxu1 %v379_v2  ;;  %v48_v34 = vand.u32 15, %v22_v21  ;;  %vm432_vm6 = vcmp.ne.s32.totalorder %v27_v33, 0 }
   0x8   :  { %vm76_vm4 = vcmp.ne.s32.totalorder %v34_v19, 15  ;;  %vm73_vm5 = vcmp.ne.s32.totalorder %v41_v20, 0 }
   0x9   :  { %vm436_vm7 = vcmp.ne.s32.totalorder %v48_v34, 15 }
   0xa   :  { %366 = vmatmul.mubr.msk.f32.gmra.mrb[2].mxu0 %vm85_vm1, %v15_v6  ;;  %372 = vmatmul.mubr.msk.f32.gmra.mrb[2].mxu1 %vm85_vm1, %v15_v6 }
   0xb   :  { %183 = vmatprep.mubr.f32.mxu0 %v379_v2  ;;  %272 = vmatprep.mubr.f32.mxu1 %v379_v2 }
   0xe   :  { %367 = vmatmul.mubr.msk.f32.gmra.mrb[4].mxu0 %vm85_vm1, %v16_v7  ;;  %373 = vmatmul.mubr.msk.f32.gmra.mrb[4].mxu1 %vm85_vm1, %v16_v7 }
   0xf   :  { %189 = vmatprep.mubr.f32.mxu0 %v379_v2  ;;  %278 = vmatprep.mubr.f32.mxu1 %v379_v2 }
  0x12   :  { %368 = vmatmul.mubr.msk.f32.gmra.mrb[6].mxu0 %vm85_vm1, %v17_v8  ;;  %374 = vmatmul.mubr.msk.f32.gmra.mrb[6].mxu1 %vm85_vm1, %v17_v8 }
  0xd9   :  { %v173_v11 = vpop.f32.mrb[0].mxu0  ;;  %v262_v12 = vpop.f32.mrb[0].mxu1 }
  0xda   :  { %v175_v15 = vpop.f32.mrb[1].mxu0  ;;  %v426_v16 = vpop.f32.mrb[1].mxu1  ;;  %v285_v22 = vrot.slane %v173_v11, 7  ;;  %v310_v23 = vrot.slane %v262_v12, 1 }
  0xdd   :  { %v179_v17 = vpop.f32.mrb[2].mxu0  ;;  %v268_v18 = vpop.f32.mrb[2].mxu1 }
  0xde   :  { %v286_v24 = vrot.slane %v179_v17, 7  ;;  %v311_v25 = vrot.slane %v268_v18, 1  ;;  %v181_v26 = vpop.f32.mrb[3].mxu0  ;;  %v270_v27 = vpop.f32.mrb[3].mxu1 }
  0xe0   :  { %v317_v28 = vsel %vm314_vm2, %v310_v23, %v311_v25  ;;  %v292_v29 = vsel %vm289_vm3, %v285_v22, %v286_v24 }
  0xe1   :  { %v307_v30 = vadd.f32 %v292_v29, %v181_v26  ;;  %v185_v31 = vpop.f32.mrb[4].mxu0  ;;  %v274_v32 = vpop.f32.mrb[4].mxu1 }
  0xe2   :  { %v287_v35 = vrot.slane %v185_v31, 7  ;;  %v312_v36 = vrot.slane %v274_v32, 1  ;;  %v187_v37 = vpop.f32.mrb[5].mxu0  ;;  %v276_v38 = vpop.f32.mrb[5].mxu1 }
  0xe4   :  { %v316_v39 = vsel %vm314_vm2, %v311_v25, %v312_v36  ;;  %v291_v40 = vsel %vm289_vm3, %v286_v24, %v287_v35 }
  0xe5   :  { %v328_v41 = vsel %vm76_vm4, %v316_v39, 0.0  ;;  %v304_v42 = vsel %vm73_vm5, %v291_v40, 0.0  ;;  %v191_v44 = vpop.f32.mrb[6].mxu0  ;;  %v280_v45 = vpop.f32.mrb[6].mxu1 }
  0xe6   :  { %v332_v47 = vadd.f32 %v328_v41, %v307_v30  ;;  %v308_v48 = vadd.f32 %v304_v42, %v187_v37  ;;  %v288_v49 = vrot.slane %v191_v44, 7  ;;  %v313_v50 = vrot.slane %v280_v45, 1  ;;  %v193_v51 = vpop.f32.mrb[7].mxu0  ;;  %v282_v52 = vpop.f32.mrb[7].mxu1 }
  0xe8   :  { %v293_v54 = vsel %vm289_vm3, %v288_v49, %v285_v22  ;;  %v315_v55 = vsel %vm314_vm2, %v312_v36, %v313_v50  ;;  %v290_v56 = vsel %vm289_vm3, %v287_v35, %v288_v49  ;;  %v318_v57 = vsel %vm314_vm2, %v313_v50, %v310_v23 }
  0xe9   :  { %v302_v58 = vsel %vm432_vm6, %v293_v54, 0.0  ;;  %v333_v59 = vadd.f32 %v315_v55, %v308_v48  ;;  %v309_v60 = vadd.f32 %v290_v56, %v193_v51  ;;  %v330_v61 = vsel %vm436_vm7, %v318_v57, 0.0 }
  0xea   :  { %v306_v62 = vadd.f32 %v302_v58, %v175_v15  ;;  %v343_v63 = vadd.f32 %v375_v53, %v332_v47 }
  0xeb   :  { %v334_v0 = vadd.f32 %v330_v61, %v309_v60  ;;  %v344_v1 = vadd.f32 %v375_v53, %v333_v59 }
  0xec   :  { %v331_v2 = vadd.f32 %v317_v28, %v306_v62  ;;  %v347_v3 = vmax.f32 %v343_v63, 0.0 }
  0xed   :  { %v345_v4 = vadd.f32 %v375_v53, %v334_v0  ;;  %v348_v5 = vmax.f32 %v344_v1, 0.0 }
  0xee   :  { %v342_v6 = vadd.f32 %v375_v53, %v331_v2  ;;  %v351_v7 = vadd.f32 %v347_v3, %v270_v27 }
  0xef   :  { %v349_v8 = vmax.f32 %v345_v4, 0.0  ;;  %v352_v9 = vadd.f32 %v348_v5, %v276_v38 }
  0xf0   :  { %v346_v10 = vmax.f32 %v342_v6, 0.0  ;;  %356 = vst.msk [vmem:[%s467_s3 + $0x8] sm:$0xff] %vm354_vm8, %v351_v7 }
  0xf1   :  { %v353_v11 = vadd.f32 %v349_v8, %v282_v52  ;;  %357 = vst.msk [vmem:[%s467_s3 + $0x10] sm:$0xff] %vm354_vm8, %v352_v9 }
  0xf2   :  { %v350_v12 = vadd.f32 %v346_v10, %v426_v16 }
  0xf3   :  { %358 = vst.msk [vmem:[%s467_s3 + $0x18] sm:$0xff] %vm354_vm8, %v353_v11 }
  0xf4   :  { %355 = vst.msk [vmem:[%s467_s3] sm:$0xff] %vm354_vm8, %v350_v12 }

</bundles_post_ra>
